<compile_context>
chip_gen: v6e
topology: v6e:2x2x1
jax: 0.10.0
libtpu: 0.0.40
codegen_flags: <defaults>
</compile_context>

<pallas_src>
import functools

import jax
import jax.numpy as jnp
from jax.experimental import pallas as pl
from jax.experimental.pallas import tpu as pltpu


def _round_up(x, m):
    return ((x + m - 1) // m) * m


def _gcn_kernel(val_ref, mask_ref, w_ref, out_ref, *, compute_dtype):
    # val_ref:  (TB, N, D)  value rows for one batch tile
    # mask_ref: (TB, N)     lane-dense neighbor mask
    # w_ref:    (D, D)      weight, resident across the grid
    # out_ref:  (TB, D)
    n_nei = val_ref.shape[1]
    w = w_ref[...].astype(compute_dtype)                 # hoisted out of the loop
    acc = jnp.zeros(out_ref.shape, jnp.float32)
    # N is a static (typically small) neighbor count -> unrolled loop of
    # (TB, D) @ (D, D) MXU matmuls; each result is masked per-row ((TB, 1) lane
    # broadcast), tanh'd on the EUP, and accumulated in f32 on the VPU.
    # TODO(synk): for very large neighbor counts switch to a fori_loop / chunked variant.
    for n in range(n_nei):
        x_n = val_ref[:, n, :].astype(compute_dtype)     # (TB, D)
        m_n = mask_ref[:, n:n + 1].astype(jnp.float32)   # (TB, 1) width-1 lane slice
        h_n = jnp.dot(x_n, w, preferred_element_type=jnp.float32)
        acc = acc + jnp.tanh(h_n * m_n)                  # mask commutes with the matmul
    out_ref[...] = acc.astype(out_ref.dtype)


def _vmem_capacity_bytes():
    try:
        return int(pltpu.get_tpu_info().vmem_capacity_bytes)
    except Exception:
        return 64 * 1024 * 1024  # conservative default (v7x per-TensorCore VMEM)


def _choose_batch_tile(B, N, D, itemsize, vmem_capacity):
    # Padded VMEM bytes of one batch row of the (TB, N, D) value block
    # (the minor two dims are tiled to (8, 128)).
    bytes_per_row = _round_up(N, 8) * _round_up(D, 128) * itemsize
    # Target ~1/8 of the chip VMEM per (double-buffered) value buffer:
    # 16 MiB tiles on 128 MiB chips (v5e/v6e), 8 MiB on v7x's 64 MiB per-core VMEM.
    budget = max(vmem_capacity // 8, 1 << 20)
    granule = 8 if itemsize >= 4 else (16 if itemsize == 2 else 32)
    tb = budget // bytes_per_row
    if tb >= B:
        if B >= 2 * granule:
            # Keep at least two grid steps so the "parallel" batch axis can shard
            # across both TensorCores on v7x (megacore in general).
            return min(B, _round_up(pl.cdiv(B, 2), granule))
        return B  # tiny batch: single step, block == full array dim is tile-legal
    return max(granule, (tb // granule) * granule)


def _working_set_bytes(TB, N, D, val_itemsize, out_itemsize, w_itemsize, mask_itemsize):
    val = TB * _round_up(N, 8) * _round_up(D, 128) * val_itemsize
    mask = _round_up(TB, 8) * _round_up(N, 128) * mask_itemsize
    out = _round_up(TB, 8) * _round_up(D, 128) * out_itemsize
    w = _round_up(D, 8) * _round_up(D, 128) * w_itemsize
    return 2 * (val + mask + out + w)  # pipeline double-buffers each operand


def gcn_encoder_forward(e1_embeded, rel_embeded, nei_embeded_key,
                        nei_embeded_value, nei_mask, dim, weight):
    """Pallas implementation of GCN_Encoder.forward (dim == 2: sum over neighbors)."""
    del e1_embeded, rel_embeded, nei_embeded_key  # unused by the reference forward
    if dim != 2:
        # TODO(synk): generalize the reduction axis if dim != 2 is ever needed.
        raise NotImplementedError("kernel implements the dim=2 (neighbor-sum) case")

    B, N, D = nei_embeded_value.shape
    val = nei_embeded_value                    # native dtype & layout: no HBM copies
    mask = nei_mask
    if not jnp.issubdtype(mask.dtype, jnp.floating):
        mask = mask.astype(jnp.float32)

    # Promote (never silently downcast) the weight to the matmul compute dtype.
    compute_dtype = jnp.promote_types(val.dtype, weight.dtype)
    w = weight.astype(compute_dtype)
    out_dtype = compute_dtype

    val_itemsize = jnp.dtype(val.dtype).itemsize
    vmem_capacity = _vmem_capacity_bytes()
    TB = _choose_batch_tile(B, N, D, val_itemsize, vmem_capacity)
    ws = _working_set_bytes(TB, N, D, val_itemsize,
                            jnp.dtype(out_dtype).itemsize,
                            jnp.dtype(compute_dtype).itemsize,
                            jnp.dtype(mask.dtype).itemsize)
    vmem_limit = int(max(32 * 1024 * 1024, min(2 * ws, vmem_capacity // 2)))

    cost = pl.CostEstimate(
        flops=2 * B * N * D * D,
        transcendentals=B * N * D,
        bytes_accessed=(val.size * val_itemsize
                        + mask.size * jnp.dtype(mask.dtype).itemsize
                        + w.size * jnp.dtype(w.dtype).itemsize
                        + B * D * jnp.dtype(out_dtype).itemsize),
    )

    kernel = functools.partial(_gcn_kernel, compute_dtype=compute_dtype)
    out = pl.pallas_call(
        kernel,
        out_shape=jax.ShapeDtypeStruct((B, D), out_dtype),
        grid_spec=pltpu.PrefetchScalarGridSpec(
            num_scalar_prefetch=0,
            grid=(pl.cdiv(B, TB),),
            in_specs=[
                pl.BlockSpec((TB, N, D), lambda b: (b, 0, 0)),  # value tile
                pl.BlockSpec((TB, N), lambda b: (b, 0)),        # lane-dense mask
                pl.BlockSpec((D, D), lambda b: (0, 0)),         # weight, resident
            ],
            out_specs=pl.BlockSpec((TB, D), lambda b: (b, 0)),
        ),
        compiler_params=pltpu.CompilerParams(
            dimension_semantics=("parallel",),
            vmem_limit_bytes=vmem_limit,
        ),
        cost_estimate=cost,
    )(val, mask, w)
    return out


def _reference(nei_embeded_value, nei_mask, weight):
    B, N, D = nei_embeded_value.shape
    fm = nei_embeded_value * nei_mask[..., None]
    out = jnp.tanh(fm.reshape(-1, D) @ weight).reshape(B, N, D)
    return out.sum(axis=1)


if __name__ == "__main__":
    key = jax.random.PRNGKey(0)

    def make_inputs(k, B, N, D, val_dtype=jnp.float32):
        k1, k2, k3, k4, k5, k6 = jax.random.split(k, 6)
        e1 = jax.random.normal(k1, (B, D), dtype=jnp.float32)        # unused by forward
        rel = jax.random.normal(k2, (B, D), dtype=jnp.float32)       # unused by forward
        nk = jax.random.normal(k3, (B, N, D), dtype=jnp.float32)     # unused by forward
        nv = jax.random.normal(k4, (B, N, D), dtype=jnp.float32).astype(val_dtype)
        nm = (jax.random.uniform(k5, (B, N)) > 0.3).astype(jnp.float32)
        bound = (6.0 / (D + D)) ** 0.5  # xavier_uniform_(gain=1) equivalent bound
        w = jax.random.uniform(k6, (D, D), dtype=jnp.float32,
                               minval=-bound, maxval=bound)
        return e1, rel, nk, nv, nm, w

    k1, k2, k3 = jax.random.split(key, 3)

    # Case 1: module-sized toy shapes (single grid step, TB == B).
    e1, rel, nk, nv, nm, w = make_inputs(k1, B=2, N=8, D=32)
    out = jax.block_until_ready(gcn_encoder_forward(e1, rel, nk, nv, nm, dim=2, weight=w))
    ref = _reference(nv, nm, w)
    assert out.shape == (2, 32)
    assert jnp.allclose(out, ref, atol=1e-5, rtol=1e-5)

    # Case 2: tiled path with a ragged last batch tile (grid > 1, no padding copies).
    e1, rel, nk, nv, nm, w = make_inputs(k2, B=50, N=16, D=128)
    out = jax.block_until_ready(gcn_encoder_forward(e1, rel, nk, nv, nm, dim=2, weight=w))
    ref = _reference(nv, nm, w)
    assert out.shape == (50, 128)
    assert jnp.allclose(out, ref, atol=1e-4, rtol=1e-5)

    # Case 3: bf16 value feed (halves HBM traffic); weight stays f32 (promoted compute).
    e1, rel, nk, nv, nm, w = make_inputs(k3, B=4, N=8, D=32, val_dtype=jnp.bfloat16)
    out = jax.block_until_ready(gcn_encoder_forward(e1, rel, nk, nv, nm, dim=2, weight=w))
    ref = _reference(nv, nm, w)
    assert out.shape == (4, 32)
    assert jnp.allclose(out, ref, atol=1e-4, rtol=1e-4)

    print("KERNEL_OK")
</pallas_src>

<mosaic_0001>
module attributes {stable_mosaic.version = 11 : i64} {
  func.func @_gcn_kernel(%arg0: i32, %arg1: memref<2x8x32xf32, #tpu.memory_space<vmem>>, %arg2: memref<2x8xf32, #tpu.memory_space<vmem>>, %arg3: memref<32x32xf32, #tpu.memory_space<vmem>>, %arg4: memref<2x32xf32, #tpu.memory_space<vmem>>) attributes {dimension_semantics = [#tpu.dimension_semantics<parallel>], iteration_bounds = array<i64: 1>, scalar_prefetch = 0 : i64, scratch_operands = 0 : i64, tpu.core_type = #tpu.core_type<tc>, window_params = [{transform_indices = @transform_0, window_bounds = array<i64: 2, 8, 32>}, {transform_indices = @transform_1, window_bounds = array<i64: 2, 8>}, {pipeline_mode = #tpu.pipeline_mode<synchronous>, transform_indices = @transform_2, window_bounds = array<i64: 32, 32>}, {transform_indices = @transform_3, window_bounds = array<i64: 2, 32>}]} {
    %c0 = arith.constant 0 : index
    %c0_0 = arith.constant 0 : index
    %0 = vector.load %arg3[%c0, %c0_0] : memref<32x32xf32, #tpu.memory_space<vmem>>, vector<32x32xf32>
    %cst = arith.constant 0.000000e+00 : f32
    %1 = vector.broadcast %cst : f32 to vector<2x32xf32>
    %c0_1 = arith.constant 0 : index
    %c0_2 = arith.constant 0 : index
    %c0_3 = arith.constant 0 : index
    %2 = vector.load %arg1[%c0_1, %c0_2, %c0_3] : memref<2x8x32xf32, #tpu.memory_space<vmem>>, vector<2x1x32xf32>
    %3 = vector.shape_cast %2 : vector<2x1x32xf32> to vector<2x32xf32>
    %c0_4 = arith.constant 0 : index
    %c0_5 = arith.constant 0 : index
    %4 = vector.load %arg2[%c0_4, %c0_5] : memref<2x8xf32, #tpu.memory_space<vmem>>, vector<2x1xf32>
    %cst_6 = arith.constant dense<0.000000e+00> : vector<2x32xf32>
    %5 = tpu.matmul %3, %0, %cst_6 {dimension_numbers = #tpu.dot_dimension_numbers<[1], [0], [0], [1], [0, 0, 1, 1], [], []>} : vector<2x32xf32>, vector<32x32xf32>, vector<2x32xf32> -> vector<2x32xf32>
    %6 = vector.broadcast %4 : vector<2x1xf32> to vector<2x32xf32>
    %7 = arith.mulf %5, %6 : vector<2x32xf32>
    %8 = math.tanh %7 : vector<2x32xf32>
    %9 = arith.addf %1, %8 : vector<2x32xf32>
    %c0_7 = arith.constant 0 : index
    %c1 = arith.constant 1 : index
    %c0_8 = arith.constant 0 : index
    %10 = vector.load %arg1[%c0_7, %c1, %c0_8] : memref<2x8x32xf32, #tpu.memory_space<vmem>>, vector<2x1x32xf32>
    %11 = vector.shape_cast %10 : vector<2x1x32xf32> to vector<2x32xf32>
    %c0_9 = arith.constant 0 : index
    %c1_10 = arith.constant 1 : index
    %12 = vector.load %arg2[%c0_9, %c1_10] : memref<2x8xf32, #tpu.memory_space<vmem>>, vector<2x1xf32>
    %cst_11 = arith.constant dense<0.000000e+00> : vector<2x32xf32>
    %13 = tpu.matmul %11, %0, %cst_11 {dimension_numbers = #tpu.dot_dimension_numbers<[1], [0], [0], [1], [0, 0, 1, 1], [], []>} : vector<2x32xf32>, vector<32x32xf32>, vector<2x32xf32> -> vector<2x32xf32>
    %14 = vector.broadcast %12 : vector<2x1xf32> to vector<2x32xf32>
    %15 = arith.mulf %13, %14 : vector<2x32xf32>
    %16 = math.tanh %15 : vector<2x32xf32>
    %17 = arith.addf %9, %16 : vector<2x32xf32>
    %c0_12 = arith.constant 0 : index
    %c2 = arith.constant 2 : index
    %c0_13 = arith.constant 0 : index
    %18 = vector.load %arg1[%c0_12, %c2, %c0_13] : memref<2x8x32xf32, #tpu.memory_space<vmem>>, vector<2x1x32xf32>
    %19 = vector.shape_cast %18 : vector<2x1x32xf32> to vector<2x32xf32>
    %c0_14 = arith.constant 0 : index
    %c2_15 = arith.constant 2 : index
    %20 = vector.load %arg2[%c0_14, %c2_15] : memref<2x8xf32, #tpu.memory_space<vmem>>, vector<2x1xf32>
    %cst_16 = arith.constant dense<0.000000e+00> : vector<2x32xf32>
    %21 = tpu.matmul %19, %0, %cst_16 {dimension_numbers = #tpu.dot_dimension_numbers<[1], [0], [0], [1], [0, 0, 1, 1], [], []>} : vector<2x32xf32>, vector<32x32xf32>, vector<2x32xf32> -> vector<2x32xf32>
    %22 = vector.broadcast %20 : vector<2x1xf32> to vector<2x32xf32>
    %23 = arith.mulf %21, %22 : vector<2x32xf32>
    %24 = math.tanh %23 : vector<2x32xf32>
    %25 = arith.addf %17, %24 : vector<2x32xf32>
    %c0_17 = arith.constant 0 : index
    %c3 = arith.constant 3 : index
    %c0_18 = arith.constant 0 : index
    %26 = vector.load %arg1[%c0_17, %c3, %c0_18] : memref<2x8x32xf32, #tpu.memory_space<vmem>>, vector<2x1x32xf32>
    %27 = vector.shape_cast %26 : vector<2x1x32xf32> to vector<2x32xf32>
    %c0_19 = arith.constant 0 : index
    %c3_20 = arith.constant 3 : index
    %28 = vector.load %arg2[%c0_19, %c3_20] : memref<2x8xf32, #tpu.memory_space<vmem>>, vector<2x1xf32>
    %cst_21 = arith.constant dense<0.000000e+00> : vector<2x32xf32>
    %29 = tpu.matmul %27, %0, %cst_21 {dimension_numbers = #tpu.dot_dimension_numbers<[1], [0], [0], [1], [0, 0, 1, 1], [], []>} : vector<2x32xf32>, vector<32x32xf32>, vector<2x32xf32> -> vector<2x32xf32>
    %30 = vector.broadcast %28 : vector<2x1xf32> to vector<2x32xf32>
    %31 = arith.mulf %29, %30 : vector<2x32xf32>
    %32 = math.tanh %31 : vector<2x32xf32>
    %33 = arith.addf %25, %32 : vector<2x32xf32>
    %c0_22 = arith.constant 0 : index
    %c4 = arith.constant 4 : index
    %c0_23 = arith.constant 0 : index
    %34 = vector.load %arg1[%c0_22, %c4, %c0_23] : memref<2x8x32xf32, #tpu.memory_space<vmem>>, vector<2x1x32xf32>
    %35 = vector.shape_cast %34 : vector<2x1x32xf32> to vector<2x32xf32>
    %c0_24 = arith.constant 0 : index
    %c4_25 = arith.constant 4 : index
    %36 = vector.load %arg2[%c0_24, %c4_25] : memref<2x8xf32, #tpu.memory_space<vmem>>, vector<2x1xf32>
    %cst_26 = arith.constant dense<0.000000e+00> : vector<2x32xf32>
    %37 = tpu.matmul %35, %0, %cst_26 {dimension_numbers = #tpu.dot_dimension_numbers<[1], [0], [0], [1], [0, 0, 1, 1], [], []>} : vector<2x32xf32>, vector<32x32xf32>, vector<2x32xf32> -> vector<2x32xf32>
    %38 = vector.broadcast %36 : vector<2x1xf32> to vector<2x32xf32>
    %39 = arith.mulf %37, %38 : vector<2x32xf32>
    %40 = math.tanh %39 : vector<2x32xf32>
    %41 = arith.addf %33, %40 : vector<2x32xf32>
    %c0_27 = arith.constant 0 : index
    %c5 = arith.constant 5 : index
    %c0_28 = arith.constant 0 : index
    %42 = vector.load %arg1[%c0_27, %c5, %c0_28] : memref<2x8x32xf32, #tpu.memory_space<vmem>>, vector<2x1x32xf32>
    %43 = vector.shape_cast %42 : vector<2x1x32xf32> to vector<2x32xf32>
    %c0_29 = arith.constant 0 : index
    %c5_30 = arith.constant 5 : index
    %44 = vector.load %arg2[%c0_29, %c5_30] : memref<2x8xf32, #tpu.memory_space<vmem>>, vector<2x1xf32>
    %cst_31 = arith.constant dense<0.000000e+00> : vector<2x32xf32>
    %45 = tpu.matmul %43, %0, %cst_31 {dimension_numbers = #tpu.dot_dimension_numbers<[1], [0], [0], [1], [0, 0, 1, 1], [], []>} : vector<2x32xf32>, vector<32x32xf32>, vector<2x32xf32> -> vector<2x32xf32>
    %46 = vector.broadcast %44 : vector<2x1xf32> to vector<2x32xf32>
    %47 = arith.mulf %45, %46 : vector<2x32xf32>
    %48 = math.tanh %47 : vector<2x32xf32>
    %49 = arith.addf %41, %48 : vector<2x32xf32>
    %c0_32 = arith.constant 0 : index
    %c6 = arith.constant 6 : index
    %c0_33 = arith.constant 0 : index
    %50 = vector.load %arg1[%c0_32, %c6, %c0_33] : memref<2x8x32xf32, #tpu.memory_space<vmem>>, vector<2x1x32xf32>
    %51 = vector.shape_cast %50 : vector<2x1x32xf32> to vector<2x32xf32>
    %c0_34 = arith.constant 0 : index
    %c6_35 = arith.constant 6 : index
    %52 = vector.load %arg2[%c0_34, %c6_35] : memref<2x8xf32, #tpu.memory_space<vmem>>, vector<2x1xf32>
    %cst_36 = arith.constant dense<0.000000e+00> : vector<2x32xf32>
    %53 = tpu.matmul %51, %0, %cst_36 {dimension_numbers = #tpu.dot_dimension_numbers<[1], [0], [0], [1], [0, 0, 1, 1], [], []>} : vector<2x32xf32>, vector<32x32xf32>, vector<2x32xf32> -> vector<2x32xf32>
    %54 = vector.broadcast %52 : vector<2x1xf32> to vector<2x32xf32>
    %55 = arith.mulf %53, %54 : vector<2x32xf32>
    %56 = math.tanh %55 : vector<2x32xf32>
    %57 = arith.addf %49, %56 : vector<2x32xf32>
    %c0_37 = arith.constant 0 : index
    %c7 = arith.constant 7 : index
    %c0_38 = arith.constant 0 : index
    %58 = vector.load %arg1[%c0_37, %c7, %c0_38] : memref<2x8x32xf32, #tpu.memory_space<vmem>>, vector<2x1x32xf32>
    %59 = vector.shape_cast %58 : vector<2x1x32xf32> to vector<2x32xf32>
    %c0_39 = arith.constant 0 : index
    %c7_40 = arith.constant 7 : index
    %60 = vector.load %arg2[%c0_39, %c7_40] : memref<2x8xf32, #tpu.memory_space<vmem>>, vector<2x1xf32>
    %cst_41 = arith.constant dense<0.000000e+00> : vector<2x32xf32>
    %61 = tpu.matmul %59, %0, %cst_41 {dimension_numbers = #tpu.dot_dimension_numbers<[1], [0], [0], [1], [0, 0, 1, 1], [], []>} : vector<2x32xf32>, vector<32x32xf32>, vector<2x32xf32> -> vector<2x32xf32>
    %62 = vector.broadcast %60 : vector<2x1xf32> to vector<2x32xf32>
    %63 = arith.mulf %61, %62 : vector<2x32xf32>
    %64 = math.tanh %63 : vector<2x32xf32>
    %65 = arith.addf %57, %64 : vector<2x32xf32>
    %c0_42 = arith.constant 0 : index
    %c0_43 = arith.constant 0 : index
    %66 = vector.load %arg4[%c0_42, %c0_43] : memref<2x32xf32, #tpu.memory_space<vmem>>, vector<2x32xf32>
    tpu.vector_store %arg4[%c0_42, %c0_43], %65 {strides = array<i32>} : memref<2x32xf32, #tpu.memory_space<vmem>>, vector<2x32xf32>,
    return
  }
  func.func @transform_0(%arg0: i32) -> (i32, i32, i32) {
    %c0_i32 = arith.constant 0 : i32
    %c0_i32_0 = arith.constant 0 : i32
    %c0_i32_1 = arith.constant 0 : i32
    return %arg0, %c0_i32, %c0_i32_0 : i32, i32, i32
  }
  func.func @transform_1(%arg0: i32) -> (i32, i32) {
    %c0_i32 = arith.constant 0 : i32
    %c0_i32_0 = arith.constant 0 : i32
    return %arg0, %c0_i32 : i32, i32
  }
  func.func @transform_2(%arg0: i32) -> (i32, i32) {
    %c0_i32 = arith.constant 0 : i32
    %c0_i32_0 = arith.constant 0 : i32
    %c0_i32_1 = arith.constant 0 : i32
    return %c0_i32, %c0_i32_0 : i32, i32
  }
  func.func @transform_3(%arg0: i32) -> (i32, i32) {
    %c0_i32 = arith.constant 0 : i32
    %c0_i32_0 = arith.constant 0 : i32
    return %arg0, %c0_i32 : i32, i32
  }
}

</mosaic_0001>

<bundles_post_ra>
// kernel: tpu_custom_call.1
= control target key start
LH: loop header
LB: loop body
LE: loop exit
PB: predicated region body
PF: predicated region fallthrough
CT: control target
= control target key end

     0   :  { %8 = vsyncpa [#allocation3], 0  ;;  %s1175_s0 = inlined_call_operand.hbm [shape: f32[2,8,32], index: 0, kind: input, shape index: {}]   ;;  %s1176_s1 = inlined_call_operand.hbm [shape: f32[2,8], index: 1, kind: input, shape index: {}]   ;;  %s1177_s2 = inlined_call_operand.hbm [shape: f32[32,32], index: 2, kind: input, shape index: {}]   ;;  %s1178_s3 = inlined_call_operand.hbm [shape: f32[2,32], index: 3, kind: output, shape index: {}]  }
   0x1   :  { %9 = vsyncpa [#allocation6], 0 }
   0x2   :  { %10 = vsyncpa [#allocation4], 0  ;;  %s1023_s12 = smov [#allocation5]   ;;  %s1024_s14 = smov [#allocation2]  }
   0x3   :  { %s29_s13 = sshll.u32 %s1023_s12, 4  ;;  %s16_s15 = sshll.u32 %s1024_s14, 4  ;;  %s30_s13 = int_to_ptr.vmem [resolvable:$true] %s29_s13  ;;  %s17_s15 = int_to_ptr.vmem [resolvable:$true] %s16_s15 }
   0x4   :  { %s945_s16 = scalar_lea.vmem %s30_s13, 32  ;;  %p950_p1 = scmp.lt.s32.totalorder %s30_s13, %s30_s13 }
   0x5   :  { %p946_p0 = scmp.ne.s32.totalorder %s30_s13, %s945_s16  ;;  %p951_p2 = scmp.lt.s32.totalorder %s945_s16, %s945_s16 }
   0x7   :  { %p952_p3 = por %p951_p2, %p950_p1 }
   0x9   :  { %p953_p4 = pnand %p952_p3, %p946_p0 }
   0xb   :  { %956 = shalt.err (!%p953_p4)
}
   0xc   :  { %32 = dma.hbm_to_vmem [thread:$0]  %s1176_s1, 32, %s30_s13, [#allocation6]  }
   0xd   :  { %s965_s19 = scalar_lea.vmem %s17_s15, 256  ;;  %p970_p6 = scmp.lt.s32.totalorder %s17_s15, %s17_s15 }
   0xe   :  { %p966_p5 = scmp.ne.s32.totalorder %s17_s15, %s965_s19  ;;  %p971_p7 = scmp.lt.s32.totalorder %s965_s19, %s965_s19 }
  0x10   :  { %p972_p8 = por %p971_p7, %p970_p6 }
  0x12   :  { %p973_p9 = pnand %p972_p8, %p966_p5 }
  0x14   :  { %976 = shalt.err (!%p973_p9)
}
  0x15   :  { %s1025_s20 = smov 128   ;;  %s1026_s21 = smov 8  }
  0x16   :  { %22 = dma.hbm_to_vmem [thread:$0]  %s1175_s0, 256, %s17_s15, [#allocation3], %s1025_s20, %s1025_s20, %s1026_s21  }
  0x17   :  { %s1027_s24 = smov [#allocation7]  }
  0x18   :  { %s38_s25 = sshll.u32 %s1027_s24, 4  ;;  %s39_s25 = int_to_ptr.vmem [resolvable:$true] %s38_s25 }
  0x19   :  { %s985_s26 = scalar_lea.vmem %s39_s25, 512  ;;  %p990_p11 = scmp.lt.s32.totalorder %s39_s25, %s39_s25 }
  0x1a   :  { %p986_p10 = scmp.ne.s32.totalorder %s39_s25, %s985_s26  ;;  %p991_p12 = scmp.lt.s32.totalorder %s985_s26, %s985_s26 }
  0x1c   :  { %p992_p13 = por %p991_p12, %p990_p11 }
  0x1e   :  { %p993_p0 = pnand %p992_p13, %p986_p10 }
  0x20   :  { %996 = shalt.err (!%p993_p0)
}
  0x21   :  { %44 = dma.hbm_to_vmem [thread:$0]  %s1177_s2, 512, %s39_s25, [#allocation6], %s1025_s20, %s1025_s20, %s1026_s21  }
  0x22   :  { %1017 = dma.done.wait [#allocation3], 256  }
  0x23   :  { %1018 = vsyncadd [#allocation3], 4294967040 }
  0x24   :  { %1019 = dma.done.wait [#allocation6], 544  }
  0x25   :  { %1020 = vsyncadd [#allocation6], 4294966752  ;;  %v1028_v0 = vmov 0.0   ;;  %vm1029_vm0 = vmmov 0   ;;  %v1030_v1 = vmov 0   ;;  %v1031_v2 = vmov 2  }
  0x26   :  { %808 = vmatprep.subr.mxu0 %v1028_v0  ;;  %819 = vmatprep.subr.mxu1 %v1028_v0  ;;  %v1074_v3 = vld [vmem:[#allocation7 + $0x18] sm:$0xff]  ;;  %v1076_v4 = vld [vmem:[#allocation7 + $0x10] sm:$0xff]  ;;  %vm64_vm1 = vcmask 1041409   ;;  %v1082_v6 = vld [vmem:[#allocation7 + $0x8] sm:$0xff]  ;;  %vm66_vm2 = vcmask 261120   ;;  %v1032_v40 = vmov 1  }
  0x27   :  { %816 = vmatprep.mubr.msk.f32.mxu0 %vm1029_vm0, %v1028_v0  ;;  %827 = vmatprep.mubr.msk.f32.mxu1 %vm1029_vm0, %v1028_v0  ;;  %v59_v5 = vld [vmem:[#allocation2 + $0x8] sm:$0x1]  ;;  %v58_v7 = vld [vmem:[#allocation2] sm:$0x1]  ;;  %v148_v9 = vld [vmem:[#allocation2 + $0x9] sm:$0x1] }
  0x28   :  { %912 = vset.pattern.permute.xlu0 %v1030_v1  ;;  %914 = vset.pattern.permute.xlu1 %v1031_v2  ;;  %v63_v8 = vrot.slane %v59_v5, 7  ;;  %v147_v10 = vld [vmem:[#allocation2 + $0x1] sm:$0x1]  ;;  %v151_v11 = vrot.slane %v148_v9, 7  ;;  %v1088_v12 = vld [vmem:[#allocation7] sm:$0xff]  ;;  %v1033_v41 = vmov 3  }
  0x29   :  { %809 = vmatpush3.msra.mxu0 %v1074_v3  ;;  %820 = vmatpush3.msra.mxu1 %v1074_v3  ;;  %v233_v15 = vld [vmem:[#allocation2 + $0xa] sm:$0x1]  ;;  %v318_v16 = vld [vmem:[#allocation2 + $0xb] sm:$0x1]  ;;  %v232_v18 = vld [vmem:[#allocation2 + $0x2] sm:$0x1] }
  0x2a   :  { %810 = vmatprep.subr.mxu0 %v1028_v0  ;;  %821 = vmatprep.subr.mxu1 %v1028_v0  ;;  %v65_v13 = vsel %vm64_vm1, %v63_v8, %v58_v7  ;;  %v152_v14 = vsel %vm64_vm1, %v151_v11, %v147_v10  ;;  %v236_v17 = vrot.slane %v233_v15, 7  ;;  %v321_v19 = vrot.slane %v318_v16, 7  ;;  %v317_v20 = vld [vmem:[#allocation2 + $0x3] sm:$0x1]  ;;  %v403_v23 = vld [vmem:[#allocation2 + $0xc] sm:$0x1] }
  0x2b   :  { %811 = vmatpush3.msra.mxu0 %v1076_v4  ;;  %822 = vmatpush3.msra.mxu1 %v1076_v4  ;;  %v488_v24 = vld [vmem:[#allocation2 + $0xd] sm:$0x1]  ;;  %v406_v25 = vrot.slane %v403_v23, 7  ;;  %v402_v26 = vld [vmem:[#allocation2 + $0x4] sm:$0x1]  ;;  %v1034_v42 = vmov 4  }
  0x2c   :  { %812 = vmatprep.subr.mxu0 %v1028_v0  ;;  %823 = vmatprep.subr.mxu1 %v1028_v0  ;;  %v237_v21 = vsel %vm64_vm1, %v236_v17, %v232_v18  ;;  %v322_v22 = vsel %vm64_vm1, %v321_v19, %v317_v20  ;;  %v491_v27 = vrot.slane %v488_v24, 7  ;;  %v487_v28 = vld [vmem:[#allocation2 + $0x5] sm:$0x1]  ;;  %v573_v31 = vld [vmem:[#allocation2 + $0xe] sm:$0x1]  ;;  %v1035_v43 = vmov 5  }
  0x2d   :  { %813 = vmatpush3.msra.mxu0 %v1082_v6  ;;  %824 = vmatpush3.msra.mxu1 %v1082_v6  ;;  %v407_v29 = vsel %vm64_vm1, %v406_v25, %v402_v26  ;;  %v658_v32 = vld [vmem:[#allocation2 + $0xf] sm:$0x1]  ;;  %v576_v33 = vrot.slane %v573_v31, 7  ;;  %v572_v35 = vld [vmem:[#allocation2 + $0x6] sm:$0x1]  ;;  %v1036_v44 = vmov 6  }
  0x2e   :  { %814 = vmatprep.subr.mxu0 %v1028_v0  ;;  %825 = vmatprep.subr.mxu1 %v1028_v0  ;;  %v492_v30 = vsel %vm64_vm1, %v491_v27, %v487_v28  ;;  %v661_v34 = vrot.slane %v658_v32, 7  ;;  %v657_v36 = vld [vmem:[#allocation2 + $0x7] sm:$0x1]  ;;  %v60_v39 = vld [vmem:[#allocation5] sm:$0x3]  ;;  %v1037_v45 = vmov 7  }
  0x2f   :  { %815 = vmatpush3.msra.mxu0 %v1088_v12  ;;  %826 = vmatpush3.msra.mxu1 %v1088_v12  ;;  %v577_v37 = vsel %vm64_vm1, %v576_v33, %v572_v35  ;;  %s1038_s0 = smov [#allocation8]   ;;  %vm742_vm3 = vcmask 254976  }
  0x30   :  { %817 = vmatmul.mubr.msk.f32.vlgmr.msra.gmra.mxu0 %vm66_vm2, %v65_v13  ;;  %830 = vmatprep.subr.mxu0 %v1028_v0  ;;  %v662_v38 = vsel %vm64_vm1, %v661_v34, %v657_v36  ;;  %s750_s2 = sshll.u32 %s1038_s0, 4  ;;  %s751_s2 = int_to_ptr.vmem [resolvable:$true] %s750_s2 }
  0x31   :  { %841 = vmatprep.subr.mxu1 %v1028_v0  ;;  %828 = vmatmul.mubr.msk.f32.vlgmr.msra.gmra.mxu1 %vm66_vm2, %v152_v14  ;;  %s997_s28 = scalar_lea.vmem %s751_s2, 32  ;;  %p1002_p2 = scmp.lt.s32.totalorder %s751_s2, %s751_s2 }
  0x32   :  { %831 = vmatpush3.msra.mxu0 %v1074_v3  ;;  %842 = vmatpush3.msra.mxu1 %v1074_v3  ;;  %p998_p1 = scmp.ne.s32.totalorder %s751_s2, %s997_s28  ;;  %p1003_p3 = scmp.lt.s32.totalorder %s997_s28, %s997_s28 }
  0x33   :  { %832 = vmatprep.subr.mxu0 %v1028_v0  ;;  %843 = vmatprep.subr.mxu1 %v1028_v0 }
  0x34   :  { %833 = vmatpush3.msra.mxu0 %v1076_v4  ;;  %844 = vmatpush3.msra.mxu1 %v1076_v4  ;;  %p1004_p4 = por %p1003_p3, %p1002_p2 }
  0x35   :  { %834 = vmatprep.subr.mxu0 %v1028_v0  ;;  %845 = vmatprep.subr.mxu1 %v1028_v0 }
  0x36   :  { %835 = vmatpush3.msra.mxu0 %v1082_v6  ;;  %846 = vmatpush3.msra.mxu1 %v1082_v6  ;;  %p1005_p5 = pnand %p1004_p4, %p998_p1 }
  0x37   :  { %836 = vmatprep.subr.mxu0 %v1028_v0  ;;  %847 = vmatprep.subr.mxu1 %v1028_v0 }
  0x38   :  { %837 = vmatpush3.msra.mxu0 %v1088_v12  ;;  %838 = vmatprep.mubr.msk.f32.mxu0 %vm1029_vm0, %v1028_v0 }
  0x39   :  { %848 = vmatpush3.msra.mxu1 %v1088_v12  ;;  %839 = vmatmul.mubr.msk.f32.vlgmr.msra.gmra.mxu0 %vm66_vm2, %v237_v21 }
  0x3a   :  { %849 = vmatprep.mubr.msk.f32.mxu1 %vm1029_vm0, %v1028_v0  ;;  %852 = vmatprep.subr.mxu0 %v1028_v0 }
  0x3b   :  { %863 = vmatprep.subr.mxu1 %v1028_v0  ;;  %850 = vmatmul.mubr.msk.f32.vlgmr.msra.gmra.mxu1 %vm66_vm2, %v322_v22 }
  0x3c   :  { %853 = vmatpush3.msra.mxu0 %v1074_v3  ;;  %864 = vmatpush3.msra.mxu1 %v1074_v3 }
  0x3d   :  { %854 = vmatprep.subr.mxu0 %v1028_v0  ;;  %865 = vmatprep.subr.mxu1 %v1028_v0 }
  0x3e   :  { %855 = vmatpush3.msra.mxu0 %v1076_v4  ;;  %866 = vmatpush3.msra.mxu1 %v1076_v4 }
  0x3f   :  { %856 = vmatprep.subr.mxu0 %v1028_v0  ;;  %867 = vmatprep.subr.mxu1 %v1028_v0 }
  0x40   :  { %857 = vmatpush3.msra.mxu0 %v1082_v6  ;;  %868 = vmatpush3.msra.mxu1 %v1082_v6 }
  0x41   :  { %858 = vmatprep.subr.mxu0 %v1028_v0  ;;  %869 = vmatprep.subr.mxu1 %v1028_v0 }
  0x42   :  { %859 = vmatpush3.msra.mxu0 %v1088_v12  ;;  %860 = vmatprep.mubr.msk.f32.mxu0 %vm1029_vm0, %v1028_v0 }
  0x43   :  { %870 = vmatpush3.msra.mxu1 %v1088_v12  ;;  %861 = vmatmul.mubr.msk.f32.vlgmr.msra.gmra.mxu0 %vm66_vm2, %v407_v29 }
  0x44   :  { %871 = vmatprep.mubr.msk.f32.mxu1 %vm1029_vm0, %v1028_v0  ;;  %874 = vmatprep.subr.mxu0 %v1028_v0 }
  0x45   :  { %885 = vmatprep.subr.mxu1 %v1028_v0  ;;  %872 = vmatmul.mubr.msk.f32.vlgmr.msra.gmra.mxu1 %vm66_vm2, %v492_v30 }
  0x46   :  { %875 = vmatpush3.msra.mxu0 %v1074_v3  ;;  %886 = vmatpush3.msra.mxu1 %v1074_v3 }
  0x47   :  { %876 = vmatprep.subr.mxu0 %v1028_v0  ;;  %887 = vmatprep.subr.mxu1 %v1028_v0 }
  0x48   :  { %877 = vmatpush3.msra.mxu0 %v1076_v4  ;;  %888 = vmatpush3.msra.mxu1 %v1076_v4 }
  0x49   :  { %878 = vmatprep.subr.mxu0 %v1028_v0  ;;  %889 = vmatprep.subr.mxu1 %v1028_v0 }
  0x4a   :  { %879 = vmatpush3.msra.mxu0 %v1082_v6  ;;  %890 = vmatpush3.msra.mxu1 %v1082_v6 }
  0x4b   :  { %880 = vmatprep.subr.mxu0 %v1028_v0  ;;  %891 = vmatprep.subr.mxu1 %v1028_v0 }
  0x4c   :  { %881 = vmatpush3.msra.mxu0 %v1088_v12  ;;  %882 = vmatprep.mubr.msk.f32.mxu0 %vm1029_vm0, %v1028_v0 }
  0x4d   :  { %892 = vmatpush3.msra.mxu1 %v1088_v12  ;;  %893 = vmatprep.mubr.msk.f32.mxu1 %vm1029_vm0, %v1028_v0 }
  0x4e   :  { %883 = vmatmul.mubr.msk.f32.vlgmr.msra.gmra.mxu0 %vm66_vm2, %v577_v37  ;;  %894 = vmatmul.mubr.msk.f32.vlgmr.msra.gmra.mxu1 %vm66_vm2, %v662_v38 }
  0x4f   :  { %141 = vperm.xlu0 %912, %v60_v39   ;;  %311 = vperm.xlu1 %914, %v60_v39  }
  0x53   :  { %913 = vset.pattern.permute.xlu0 %v1032_v40  ;;  %915 = vset.pattern.permute.xlu1 %v1033_v41 }
  0x54   :  { %226 = vperm.xlu0 %913, %v60_v39   ;;  %396 = vperm.xlu1 %915, %v60_v39  }
  0x58   :  { %916 = vset.pattern.permute.xlu1 %v1034_v42  ;;  %917 = vset.pattern.permute.xlu0 %v1035_v43 }
  0x59   :  { %481 = vperm.xlu1 %916, %v60_v39   ;;  %566 = vperm.xlu0 %917, %v60_v39  }
  0x5d   :  { %918 = vset.pattern.permute.xlu1 %v1036_v44  ;;  %920 = vset.pattern.permute.xlu0 %v1037_v45 }
  0x5e   :  { %651 = vperm.xlu1 %918, %v60_v39  }
  0x62   :  { %919 = vset.pattern.permute.xlu1 %v1037_v45 }
  0x63   :  { %736 = vperm.xlu1 %919, %v60_v39  }
  0xca   :  { %v142_v50 = vpop.permute.xlu0 %141  ;;  %v312_v51 = vpop.permute.xlu1 %311 }
  0xcf   :  { %v227_v53 = vpop.permute.xlu0 %226  ;;  %v397_v57 = vpop.permute.xlu1 %396 }
  0xd4   :  { %v482_v61 = vpop.permute.xlu1 %481  ;;  %v567_v3 = vpop.permute.xlu0 %566 }
  0xd9   :  { %v652_v4 = vpop.permute.xlu1 %651 }
  0xde   :  { %v737_v7 = vpop.permute.xlu1 %736 }
  0xf0   :  { %v135_v46 = vpop.f32.mrf.mxu0 }
  0xf1   :  { %v221_v47 = vpop.f32.mrf.mxu1  ;;  %v144_v56 = vmul.f32 %v142_v50, %v135_v46 }
  0xf2   :  { %v818_v48 = vpop.f32.mrf.mxu0  ;;  %v229_v58 = vmul.f32 %v227_v53, %v221_v47 }
  0xf3   :  { %v829_v49 = vpop.f32.mrf.mxu1  ;;  %921 = vtanh.f32 %v144_v56 }
  0xf4   :  { %923 = vtanh.f32 %v229_v58 }
  0xf9   :  { %v306_v52 = vpop.f32.mrf.mxu0 }
  0xfa   :  { %v314_v60 = vmul.f32 %v312_v51, %v306_v52 }
  0xfb   :  { %v391_v54 = vpop.f32.mrf.mxu1  ;;  %v840_v55 = vpop.f32.mrf.mxu0 }
  0xfc   :  { %925 = vtanh.f32 %v314_v60  ;;  %v399_v62 = vmul.f32 %v397_v57, %v391_v54 }
  0xfd   :  { %v851_v59 = vpop.f32.mrf.mxu1 }
  0xfe   :  { %927 = vtanh.f32 %v399_v62 }
 0x100   :  { %v922_v8 = vpop.eup %921 }
 0x101   :  { %v924_v9 = vpop.eup %923 }
 0x102   :  { %v231_v17 = vadd.f32 %v924_v9, %v922_v8 }
 0x103   :  { %v476_v63 = vpop.f32.mrf.mxu0 }
 0x104   :  { %v484_v0 = vmul.f32 %v482_v61, %v476_v63 }
 0x105   :  { %v561_v1 = vpop.f32.mrf.mxu1  ;;  %v862_v2 = vpop.f32.mrf.mxu0 }
 0x106   :  { %929 = vtanh.f32 %v484_v0  ;;  %v569_v6 = vmul.f32 %v567_v3, %v561_v1 }
 0x107   :  { %v873_v5 = vpop.f32.mrf.mxu1 }
 0x108   :  { %931 = vtanh.f32 %v569_v6 }
 0x109   :  { %v926_v14 = vpop.eup %925 }
 0x10a   :  { %v316_v18 = vadd.f32 %v926_v14, %v231_v17 }
 0x10b   :  { %v928_v19 = vpop.eup %927 }
 0x10c   :  { %v401_v21 = vadd.f32 %v928_v19, %v316_v18 }
 0x10e   :  { %v646_v10 = vpop.f32.mrf.mxu0  ;;  %v731_v11 = vpop.f32.mrf.mxu1 }
 0x10f   :  { %v654_v12 = vmul.f32 %v652_v4, %v646_v10  ;;  %v739_v13 = vmul.f32 %v737_v7, %v731_v11 }
 0x110   :  { %v884_v15 = vpop.f32.mrf.mxu0  ;;  %v895_v16 = vpop.f32.mrf.mxu1 }
 0x111   :  { %933 = vtanh.f32 %v654_v12 }
 0x112   :  { %935 = vtanh.f32 %v739_v13 }
 0x113   :  { %v930_v20 = vpop.eup %929 }
 0x114   :  { %v486_v22 = vadd.f32 %v930_v20, %v401_v21 }
 0x115   :  { %v932_v23 = vpop.eup %931 }
 0x116   :  { %v571_v24 = vadd.f32 %v932_v23, %v486_v22 }
 0x11e   :  { %v934_v25 = vpop.eup %933 }
 0x11f   :  { %v936_v26 = vpop.eup %935  ;;  %v656_v27 = vadd.f32 %v934_v25, %v571_v24 }
 0x121   :  { %v741_v28 = vadd.f32 %v936_v26, %v656_v27 }
 0x123   :  { %743 = vst.msk [vmem:[#allocation8] sm:$0x3] %vm742_vm3, %v741_v28 }
 0x124   :  { %1008 = shalt.err (!%p1005_p5)
}
 0x125   :  { %753 = dma.vmem_to_hbm [thread:$0]  %s751_s2, 32, %s1178_s3, [#allocation4]  }
 0x126   :  { %1021 = dma.done.wait [#allocation4], 32  }
 0x127   :  { %1022 = vsyncadd [#allocation4], 4294967264 }
 0x128   :  { %757 = vsyncpa [#allocation3], 1 }
 0x129   :  { %758 = vsyncpa [#allocation6], 1 }
 0x12a   :  { %759 = vsyncpa [#allocation4], 1 }

</bundles_post_ra>
